<compile_context>
chip_gen: v7x
topology: tpu7x:2x2x1
jax: 0.10.0
libtpu: 0.0.40
codegen_flags: <defaults>
</compile_context>

<pallas_src>
import numpy as np
import jax
import jax.numpy as jnp
from jax.experimental import pallas as pl
from jax.experimental.pallas import tpu as pltpu

HID = 32  # sdf MLP hidden width


# ---------------------------------------------------------------------------
# Mesh construction (NumPy port of yet_another_meshing) -- host-side setup.
# ---------------------------------------------------------------------------
def yet_another_meshing(res):
    hr = res // 2
    main_vertices = (
        np.stack(
            np.meshgrid(np.arange(hr), np.arange(hr), np.arange(hr), indexing="ij"),
            axis=-1,
        )
        * 2
    ).reshape(-1, 3).tolist()
    triangles = []
    new_id = hr ** 3
    lower_id = -1
    for i in range(hr):
        for j in range(hr):
            for k in range(hr):
                main_vertices.append([i * 2 + 1, j * 2 + 1, k * 2 + 1])
                offset = i * hr ** 2 + j * hr + k
                if k < hr - 1:
                    triangles.append((new_id, offset, offset + 1))
                if j < hr - 1:
                    triangles.append((new_id, offset, offset + hr))
                if j < hr - 1 and k < hr - 1:
                    triangles.append((new_id, offset + hr, offset + hr + 1))
                    triangles.append((new_id, offset + 1, offset + hr + 1))
                whole_row = hr ** 2
                offset += hr ** 2
                if i < hr - 1:
                    triangles.append((new_id, offset, offset - whole_row))
                    if k < hr - 1:
                        triangles.append((new_id, offset, offset + 1))
                        triangles.append((new_id, offset + 1 - whole_row, offset + 1))
                    if j < hr - 1:
                        triangles.append((new_id, offset, offset + hr))
                        triangles.append((new_id, offset + hr - whole_row, offset + hr))
                    if j < hr - 1 and k < hr - 1:
                        triangles.append((new_id, offset + hr, offset + hr + 1))
                        triangles.append((new_id, offset + 1, offset + hr + 1))
                        triangles.append(
                            (new_id, offset + hr + 1 - whole_row, offset + hr + 1)
                        )
                offset -= whole_row
                if k < hr - 1:
                    triangles.append((new_id, new_id + 1, offset + 1))
                if j < hr - 1:
                    triangles.append((new_id, new_id + hr, offset + hr))
                if j < hr - 1 and k < hr - 1:
                    triangles.append((new_id, new_id + 1, offset + hr + 1))
                    triangles.append((new_id, new_id + hr, offset + hr + 1))
                if i < hr - 1:
                    lower_id = new_id + hr * hr
                offset += whole_row
                if i < hr - 1:
                    triangles.append((new_id, lower_id, offset))
                    if k < hr - 1:
                        triangles.append((new_id, new_id + 1, offset + 1))
                        triangles.append((new_id, lower_id, offset + 1))
                    if j < hr - 1:
                        triangles.append((new_id, new_id + hr, offset + hr))
                        triangles.append((new_id, lower_id, offset + hr))
                    if j < hr - 1 and k < hr - 1:
                        triangles.append((new_id, new_id + 1, offset + hr + 1))
                        triangles.append((new_id, new_id + hr, offset + hr + 1))
                        triangles.append((new_id, lower_id, offset + hr + 1))
                new_id += 1
    verts = np.array(main_vertices, dtype=np.float32)
    faces = np.array(triangles, dtype=np.int64)
    return verts, faces


def build_one_ring(n_verts, faces):
    """Unique undirected edges from triangles -> padded one-ring index table."""
    edges = np.concatenate([faces[:, [0, 1]], faces[:, [1, 2]], faces[:, [0, 2]]], 0)
    edges = np.unique(np.sort(edges, axis=1), axis=0)
    adj = [set() for _ in range(n_verts)]
    for a, b in edges:
        adj[int(a)].add(int(b))
        adj[int(b)].add(int(a))
    rings = [sorted(s) for s in adj]
    max_len = max(max((len(r) for r in rings), default=1), 1)
    idx = np.full((n_verts, max_len), -1, dtype=np.int64)
    for i, r in enumerate(rings):
        idx[i, : len(r)] = r
    return idx


def build_laplacian_matrix(n_verts, ring_idx):
    """L = A - diag(deg) from the padded one-ring table (host precompute)."""
    rp = ring_idx.shape[1]
    rows = np.repeat(np.arange(n_verts), rp)
    cols = ring_idx.reshape(-1)
    valid = cols >= 0
    adj = np.zeros((n_verts, n_verts), np.float32)
    adj[rows[valid], cols[valid]] = 1.0
    deg = adj.sum(axis=1)
    return adj - np.diag(deg)


# ---------------------------------------------------------------------------
# Fused Pallas kernel: feature-major sdf MLP + Laplacian matvec.
# ---------------------------------------------------------------------------
def _fused_kernel_factory(tv, num_tiles):
    def kernel(pts_ref, w1_ref, b1_ref, w2_ref, b2_ref, w3_ref, b3_ref,
               lmat_ref, sdf_ref, lap_ref):
        # pts_ref: (3, Vp) full-resident; activations are (HID, Vp) lane-dense.
        x = pts_ref[...]
        h = jnp.dot(w1_ref[...], x, preferred_element_type=jnp.float32) + b1_ref[...]
        h = jnp.maximum(h, 0.0)
        h = jnp.dot(w2_ref[...], h, preferred_element_type=jnp.float32) + b2_ref[...]
        h = jnp.maximum(h, 0.0)
        sdf_full = (
            jnp.dot(w3_ref[...], h, preferred_element_type=jnp.float32) + b3_ref[...]
        )  # (1, Vp)

        # lap tile = sdf_row @ L[:, j*tv:(j+1)*tv]   (L already contains -deg on diag)
        lap_ref[...] = jnp.dot(
            sdf_full, lmat_ref[...], preferred_element_type=jnp.float32
        )  # (1, tv)

        if num_tiles == 1:
            sdf_ref[...] = sdf_full
        else:
            j = pl.program_id(0)
            sdf_ref[...] = jax.lax.dynamic_slice(sdf_full, (0, j * tv), (1, tv))

    return kernel


def laplacian_fused(points_t, params_t, lmat, tv):
    """points_t: (3, Vp) f32, lmat: (Vp, Vp) f32 -> (sdf, lap) each (1, Vp)."""
    c, vp = points_t.shape
    w1t, b1c, w2t, b2c, w3t, b3c = params_t
    num_tiles = vp // tv

    def const(shape):
        return pl.BlockSpec(shape, lambda j: (0, 0))

    return pl.pallas_call(
        _fused_kernel_factory(tv, num_tiles),
        out_shape=(
            jax.ShapeDtypeStruct((1, vp), jnp.float32),  # sdf (lane-dense)
            jax.ShapeDtypeStruct((1, vp), jnp.float32),  # lap (lane-dense)
        ),
        grid_spec=pltpu.PrefetchScalarGridSpec(
            num_scalar_prefetch=0,
            grid=(num_tiles,),
            in_specs=[
                const((c, vp)),                                # points, full-resident
                const(w1t.shape), const(b1c.shape),            # MLP weights (tiny)
                const(w2t.shape), const(b2c.shape),
                const(w3t.shape), const(b3c.shape),
                pl.BlockSpec((vp, tv), lambda j: (0, j)),      # Laplacian column block
            ],
            out_specs=(
                pl.BlockSpec((1, tv), lambda j: (0, j)),
                pl.BlockSpec((1, tv), lambda j: (0, j)),
            ),
        ),
        compiler_params=pltpu.CompilerParams(dimension_semantics=("parallel",)),
    )(points_t, w1t, b1c, w2t, b2c, w3t, b3c, lmat)


# ---------------------------------------------------------------------------
# Module equivalent
# ---------------------------------------------------------------------------
class LaplacianPallas:
    def __init__(self, resolution, params):
        self.resolution = resolution
        verts, faces = yet_another_meshing(resolution)
        v = verts.shape[0]
        ring_idx = build_one_ring(v, faces)
        lmat = build_laplacian_matrix(v, ring_idx)

        scale = 1.0 / (resolution - 1)
        verts_scaled = (verts * scale).astype(np.float32)

        # Kept only for the pure-JAX reference check in __main__.
        self.verts_central_nodes = jnp.asarray(verts_scaled, jnp.float32)
        safe_idx = np.where(ring_idx < 0, v - 1, ring_idx)  # torch -1 wraps to last
        self.verts_one_ring = jnp.asarray(verts_scaled[safe_idx], jnp.float32)
        self.one_ring_mask = jnp.asarray((ring_idx != -1).astype(np.float32))

        # Pad V to a lane-friendly multiple; tile the lane axis by `tv`.
        tv = 512 if v > 512 else ((v + 127) // 128) * 128
        vp = ((v + tv - 1) // tv) * tv
        pts_t = np.zeros((3, vp), np.float32)
        pts_t[:, :v] = verts_scaled.T
        lmat_p = np.zeros((vp, vp), np.float32)
        lmat_p[:v, :v] = lmat  # zero rows/cols for padded vertices

        w1, b1, w2, b2, w3, b3 = params
        # Feature-major (transposed) weights so the point dim lives on lanes.
        self.params_t = (
            jnp.asarray(w1, jnp.float32).T,  # (HID, 3)
            jnp.asarray(b1, jnp.float32).T,  # (HID, 1)
            jnp.asarray(w2, jnp.float32).T,  # (HID, HID)
            jnp.asarray(b2, jnp.float32).T,  # (HID, 1)
            jnp.asarray(w3, jnp.float32).T,  # (1, HID)
            jnp.asarray(b3, jnp.float32).T,  # (1, 1)
        )
        self.points_t = jnp.asarray(pts_t)
        self.lmat = jnp.asarray(lmat_p)
        self.V, self.Vp, self.tv = v, vp, tv

    def forward(self):
        sdf, lap = laplacian_fused(self.points_t, self.params_t, self.lmat, self.tv)
        return sdf[0, : self.V], lap[0, : self.V]


# ---------------------------------------------------------------------------
if __name__ == "__main__":
    resolution = 8  # -> V = 2 * (res//2)**3 = 128 vertices

    key = jax.random.PRNGKey(0)
    k1, k2, k3, k4, k5, k6 = jax.random.split(key, 6)
    params = (
        jax.random.normal(k1, (3, HID), jnp.float32) / np.sqrt(3.0),
        jax.random.normal(k2, (1, HID), jnp.float32) * 0.1,
        jax.random.normal(k3, (HID, HID), jnp.float32) / np.sqrt(float(HID)),
        jax.random.normal(k4, (1, HID), jnp.float32) * 0.1,
        jax.random.normal(k5, (HID, 1), jnp.float32) / np.sqrt(float(HID)),
        jax.random.normal(k6, (1, 1), jnp.float32) * 0.1,
    )

    module = LaplacianPallas(resolution, params)
    sdf, lap = module.forward()
    sdf = jax.block_until_ready(sdf)
    lap = jax.block_until_ready(lap)

    # Pure-JAX reference (original masked one-ring formulation) for sanity.
    def sdf_ref_fn(x):
        w1, b1, w2, b2, w3, b3 = params
        h = jnp.maximum(x @ w1 + b1, 0.0)
        h = jnp.maximum(h @ w2 + b2, 0.0)
        return (h @ w3 + b3)[..., 0]

    v, rp = module.one_ring_mask.shape
    ring_sdf_r = sdf_ref_fn(module.verts_one_ring.reshape(-1, 3)).reshape(v, rp)
    center_r = sdf_ref_fn(module.verts_central_nodes)
    lap_r = (ring_sdf_r * module.one_ring_mask).sum(-1) - module.one_ring_mask.sum(
        -1
    ) * center_r

    np.testing.assert_allclose(np.asarray(sdf), np.asarray(center_r), rtol=1e-3, atol=1e-3)
    np.testing.assert_allclose(np.asarray(lap), np.asarray(lap_r), rtol=1e-3, atol=1e-3)

    print("KERNEL_OK")
</pallas_src>

<mosaic_0001>
module attributes {stable_mosaic.version = 11 : i64} {
  func.func @kernel(%arg0: i32, %arg1: memref<3x128xf32, #tpu.memory_space<vmem>>, %arg2: memref<32x3xf32, #tpu.memory_space<vmem>>, %arg3: memref<32x1xf32, #tpu.memory_space<vmem>>, %arg4: memref<32x32xf32, #tpu.memory_space<vmem>>, %arg5: memref<32x1xf32, #tpu.memory_space<vmem>>, %arg6: memref<1x32xf32, #tpu.memory_space<vmem>>, %arg7: memref<1x1xf32, #tpu.memory_space<vmem>>, %arg8: memref<128x128xf32, #tpu.memory_space<vmem>>, %arg9: memref<1x128xf32, #tpu.memory_space<vmem>>, %arg10: memref<1x128xf32, #tpu.memory_space<vmem>>) attributes {dimension_semantics = [#tpu.dimension_semantics<parallel>], iteration_bounds = array<i64: 1>, scalar_prefetch = 0 : i64, scratch_operands = 0 : i64, tpu.core_type = #tpu.core_type<tc>, window_params = [{pipeline_mode = #tpu.pipeline_mode<synchronous>, transform_indices = @transform_0, window_bounds = array<i64: 3, 128>}, {pipeline_mode = #tpu.pipeline_mode<synchronous>, transform_indices = @transform_1, window_bounds = array<i64: 32, 3>}, {pipeline_mode = #tpu.pipeline_mode<synchronous>, transform_indices = @transform_2, window_bounds = array<i64: 32, 1>}, {pipeline_mode = #tpu.pipeline_mode<synchronous>, transform_indices = @transform_3, window_bounds = array<i64: 32, 32>}, {pipeline_mode = #tpu.pipeline_mode<synchronous>, transform_indices = @transform_4, window_bounds = array<i64: 32, 1>}, {pipeline_mode = #tpu.pipeline_mode<synchronous>, transform_indices = @transform_5, window_bounds = array<i64: 1, 32>}, {pipeline_mode = #tpu.pipeline_mode<synchronous>, transform_indices = @transform_6, window_bounds = array<i64: 1, 1>}, {transform_indices = @transform_7, window_bounds = array<i64: 128, 128>}, {transform_indices = @transform_8, window_bounds = array<i64: 1, 128>}, {transform_indices = @transform_9, window_bounds = array<i64: 1, 128>}]} {
    %c0 = arith.constant 0 : index
    %c0_0 = arith.constant 0 : index
    %0 = vector.load %arg1[%c0, %c0_0] : memref<3x128xf32, #tpu.memory_space<vmem>>, vector<3x128xf32>
    %c0_1 = arith.constant 0 : index
    %c0_2 = arith.constant 0 : index
    %1 = vector.load %arg2[%c0_1, %c0_2] : memref<32x3xf32, #tpu.memory_space<vmem>>, vector<32x3xf32>
    %cst = arith.constant dense<0.000000e+00> : vector<32x128xf32>
    %2 = tpu.matmul %1, %0, %cst {dimension_numbers = #tpu.dot_dimension_numbers<[1], [0], [0], [1], [0, 0, 1, 1], [], []>} : vector<32x3xf32>, vector<3x128xf32>, vector<32x128xf32> -> vector<32x128xf32>
    %c0_3 = arith.constant 0 : index
    %c0_4 = arith.constant 0 : index
    %3 = vector.load %arg3[%c0_3, %c0_4] : memref<32x1xf32, #tpu.memory_space<vmem>>, vector<32x1xf32>
    %4 = vector.broadcast %3 : vector<32x1xf32> to vector<32x128xf32>
    %5 = arith.addf %2, %4 : vector<32x128xf32>
    %cst_5 = arith.constant 0.000000e+00 : f32
    %6 = vector.broadcast %cst_5 : f32 to vector<32x128xf32>
    %7 = arith.maximumf %5, %6 : vector<32x128xf32>
    %c0_6 = arith.constant 0 : index
    %c0_7 = arith.constant 0 : index
    %8 = vector.load %arg4[%c0_6, %c0_7] : memref<32x32xf32, #tpu.memory_space<vmem>>, vector<32x32xf32>
    %cst_8 = arith.constant dense<0.000000e+00> : vector<32x128xf32>
    %9 = tpu.matmul %8, %7, %cst_8 {dimension_numbers = #tpu.dot_dimension_numbers<[1], [0], [0], [1], [0, 0, 1, 1], [], []>} : vector<32x32xf32>, vector<32x128xf32>, vector<32x128xf32> -> vector<32x128xf32>
    %c0_9 = arith.constant 0 : index
    %c0_10 = arith.constant 0 : index
    %10 = vector.load %arg5[%c0_9, %c0_10] : memref<32x1xf32, #tpu.memory_space<vmem>>, vector<32x1xf32>
    %11 = vector.broadcast %10 : vector<32x1xf32> to vector<32x128xf32>
    %12 = arith.addf %9, %11 : vector<32x128xf32>
    %cst_11 = arith.constant 0.000000e+00 : f32
    %13 = vector.broadcast %cst_11 : f32 to vector<32x128xf32>
    %14 = arith.maximumf %12, %13 : vector<32x128xf32>
    %c0_12 = arith.constant 0 : index
    %c0_13 = arith.constant 0 : index
    %15 = vector.load %arg6[%c0_12, %c0_13] : memref<1x32xf32, #tpu.memory_space<vmem>>, vector<1x32xf32>
    %cst_14 = arith.constant dense<0.000000e+00> : vector<1x128xf32>
    %16 = tpu.matmul %15, %14, %cst_14 {dimension_numbers = #tpu.dot_dimension_numbers<[1], [0], [0], [1], [0, 0, 1, 1], [], []>} : vector<1x32xf32>, vector<32x128xf32>, vector<1x128xf32> -> vector<1x128xf32>
    %c0_15 = arith.constant 0 : index
    %c0_16 = arith.constant 0 : index
    %17 = vector.load %arg7[%c0_15, %c0_16] : memref<1x1xf32, #tpu.memory_space<vmem>>, vector<1x1xf32>
    %18 = vector.broadcast %17 : vector<1x1xf32> to vector<1x128xf32>
    %19 = arith.addf %16, %18 : vector<1x128xf32>
    %c0_17 = arith.constant 0 : index
    %c0_18 = arith.constant 0 : index
    %20 = vector.load %arg8[%c0_17, %c0_18] : memref<128x128xf32, #tpu.memory_space<vmem>>, vector<128x128xf32>
    %cst_19 = arith.constant dense<0.000000e+00> : vector<1x128xf32>
    %21 = tpu.matmul %19, %20, %cst_19 {dimension_numbers = #tpu.dot_dimension_numbers<[1], [0], [0], [1], [0, 0, 1, 1], [], []>} : vector<1x128xf32>, vector<128x128xf32>, vector<1x128xf32> -> vector<1x128xf32>
    %c0_20 = arith.constant 0 : index
    %c0_21 = arith.constant 0 : index
    %22 = vector.load %arg10[%c0_20, %c0_21] : memref<1x128xf32, #tpu.memory_space<vmem>>, vector<1x128xf32>
    tpu.vector_store %arg10[%c0_20, %c0_21], %21 {strides = array<i32>} : memref<1x128xf32, #tpu.memory_space<vmem>>, vector<1x128xf32>,
    %c0_22 = arith.constant 0 : index
    %c0_23 = arith.constant 0 : index
    %23 = vector.load %arg9[%c0_22, %c0_23] : memref<1x128xf32, #tpu.memory_space<vmem>>, vector<1x128xf32>
    tpu.vector_store %arg9[%c0_22, %c0_23], %19 {strides = array<i32>} : memref<1x128xf32, #tpu.memory_space<vmem>>, vector<1x128xf32>,
    return
  }
  func.func @transform_0(%arg0: i32) -> (i32, i32) {
    %c0_i32 = arith.constant 0 : i32
    %c0_i32_0 = arith.constant 0 : i32
    %c0_i32_1 = arith.constant 0 : i32
    return %c0_i32, %c0_i32_0 : i32, i32
  }
  func.func @transform_1(%arg0: i32) -> (i32, i32) {
    %c0_i32 = arith.constant 0 : i32
    %c0_i32_0 = arith.constant 0 : i32
    %c0_i32_1 = arith.constant 0 : i32
    return %c0_i32, %c0_i32_0 : i32, i32
  }
  func.func @transform_2(%arg0: i32) -> (i32, i32) {
    %c0_i32 = arith.constant 0 : i32
    %c0_i32_0 = arith.constant 0 : i32
    %c0_i32_1 = arith.constant 0 : i32
    return %c0_i32, %c0_i32_0 : i32, i32
  }
  func.func @transform_3(%arg0: i32) -> (i32, i32) {
    %c0_i32 = arith.constant 0 : i32
    %c0_i32_0 = arith.constant 0 : i32
    %c0_i32_1 = arith.constant 0 : i32
    return %c0_i32, %c0_i32_0 : i32, i32
  }
  func.func @transform_4(%arg0: i32) -> (i32, i32) {
    %c0_i32 = arith.constant 0 : i32
    %c0_i32_0 = arith.constant 0 : i32
    %c0_i32_1 = arith.constant 0 : i32
    return %c0_i32, %c0_i32_0 : i32, i32
  }
  func.func @transform_5(%arg0: i32) -> (i32, i32) {
    %c0_i32 = arith.constant 0 : i32
    %c0_i32_0 = arith.constant 0 : i32
    %c0_i32_1 = arith.constant 0 : i32
    return %c0_i32, %c0_i32_0 : i32, i32
  }
  func.func @transform_6(%arg0: i32) -> (i32, i32) {
    %c0_i32 = arith.constant 0 : i32
    %c0_i32_0 = arith.constant 0 : i32
    %c0_i32_1 = arith.constant 0 : i32
    return %c0_i32, %c0_i32_0 : i32, i32
  }
  func.func @transform_7(%arg0: i32) -> (i32, i32) {
    %c0_i32 = arith.constant 0 : i32
    %c0_i32_0 = arith.constant 0 : i32
    return %c0_i32, %arg0 : i32, i32
  }
  func.func @transform_8(%arg0: i32) -> (i32, i32) {
    %c0_i32 = arith.constant 0 : i32
    %c0_i32_0 = arith.constant 0 : i32
    return %c0_i32, %arg0 : i32, i32
  }
  func.func @transform_9(%arg0: i32) -> (i32, i32) {
    %c0_i32 = arith.constant 0 : i32
    %c0_i32_0 = arith.constant 0 : i32
    return %c0_i32, %arg0 : i32, i32
  }
}

</mosaic_0001>

<bundles_post_ra>
// kernel: tpu_custom_call.1
= control target key start
LH: loop header
LB: loop body
LE: loop exit
PB: predicated region body
PF: predicated region fallthrough
CT: control target
= control target key end

     0   :  { %s1038_s0 = inlined_call_operand.hbm [shape: f32[3,128], index: 0, kind: input, shape index: {}]   ;;  %s1039_s1 = inlined_call_operand.vmem [shape: f32[32,3], index: 1, kind: input, shape index: {}]   ;;  %s1040_s2 = inlined_call_operand.vmem [shape: f32[32,1], index: 2, kind: input, shape index: {}]   ;;  %s1041_s3 = inlined_call_operand.hbm [shape: f32[32,32], index: 3, kind: input, shape index: {}]   ;;  %s1042_s4 = inlined_call_operand.vmem [shape: f32[32,1], index: 4, kind: input, shape index: {}]   ;;  %s1043_s5 = inlined_call_operand.hbm [shape: f32[1,32], index: 5, kind: input, shape index: {}]   ;;  %s1044_s6 = inlined_call_operand.<no memory space> [shape: f32[1,1], index: 6, kind: input, shape index: {}]   ;;  %s1045_s7 = inlined_call_operand.vmem [shape: f32[128,128], index: 7, kind: input, shape index: {}]   ;;  %s1046_s8 = inlined_call_operand.hbm [shape: f32[1,128], index: 8, kind: output, shape index: {0}]   ;;  %s1047_s9 = inlined_call_operand.hbm [shape: f32[1,128], index: 9, kind: output, shape index: {1}]  }
   0x1   :  { %v15_v0 = vstv %s1044_s6 }
   0x2   :  { %16 = vst [vmem:[#allocation2] sm:$0x1] %v15_v0 }
   0x3   :  { %17 = vsyncpa [#allocation4], 0 }
   0x4   :  { %18 = vsyncpa [#allocation7], 0 }
   0x5   :  { %19 = vsyncpa [#allocation5], 0 }
   0x6   :  { %20 = vsyncpa [#allocation11], 0  ;;  %s821_s11 = smov [#allocation6]   ;;  %s703_s15 = scalar_lea.hbm %s1041_s3, 512 }
   0x7   :  { %s40_s12 = sshll.u32 %s821_s11, 4  ;;  %p704_p0 = scmp.ne.s32.totalorder %s1041_s3, %s703_s15  ;;  %s41_s12 = int_to_ptr.vmem [resolvable:$true] %s40_s12 }
   0x8   :  { %p707_p1 = scmp.lt.u32.totalorder %s703_s15, %s1041_s3 }
   0xa   :  { %p709_p2 = pnand %p707_p1, %p704_p0 }
   0xc   :  { %712 = shalt.err (!%p709_p2)
}
   0xd   :  { %s713_s6 = scalar_lea.vmem %s41_s12, 512  ;;  %p718_p4 = scmp.lt.s32.totalorder %s41_s12, %s41_s12 }
   0xe   :  { %p714_p3 = scmp.ne.s32.totalorder %s41_s12, %s713_s6  ;;  %p719_p5 = scmp.lt.s32.totalorder %s713_s6, %s713_s6 }
  0x10   :  { %p720_p6 = por %p719_p5, %p718_p4 }
  0x12   :  { %p721_p7 = pnand %p720_p6, %p714_p3 }
  0x14   :  { %724 = shalt.err (!%p721_p7)
}
  0x15   :  { %s822_s20 = smov 128   ;;  %s823_s21 = smov 8  }
  0x16   :  { %46 = dma.hbm_to_vmem [thread:$0]  %s1041_s3, 512, %s41_s12, [#allocation7], %s822_s20, %s822_s20, %s823_s21  }
  0x17   :  { %s824_s24 = smov [#allocation3]   ;;  %s825_s26 = smov [#allocation8]  }
  0x18   :  { %s27_s25 = sshll.u32 %s824_s24, 4  ;;  %s55_s27 = sshll.u32 %s825_s26, 4  ;;  %s28_s25 = int_to_ptr.vmem [resolvable:$true] %s27_s25  ;;  %s56_s27 = int_to_ptr.vmem [resolvable:$true] %s55_s27 }
  0x19   :  { %s725_s30 = scalar_lea.hbm %s1038_s0, 64 }
  0x1a   :  { %p726_p8 = scmp.ne.s32.totalorder %s1038_s0, %s725_s30  ;;  %p729_p9 = scmp.lt.u32.totalorder %s725_s30, %s1038_s0 }
  0x1c   :  { %p731_p10 = pnand %p729_p9, %p726_p8 }
  0x1e   :  { %734 = shalt.err (!%p731_p10)
}
  0x1f   :  { %s735_s3 = scalar_lea.vmem %s28_s25, 64  ;;  %p740_p12 = scmp.lt.s32.totalorder %s28_s25, %s28_s25 }
  0x20   :  { %p736_p11 = scmp.ne.s32.totalorder %s28_s25, %s735_s3  ;;  %p741_p13 = scmp.lt.s32.totalorder %s735_s3, %s735_s3 }
  0x22   :  { %p742_p0 = por %p741_p13, %p740_p12 }
  0x24   :  { %p743_p1 = pnand %p742_p0, %p736_p11 }
  0x26   :  { %746 = shalt.err (!%p743_p1)
}
  0x27   :  { %30 = dma.hbm_to_vmem [thread:$0]  %s1038_s0, 64, %s28_s25, [#allocation4]  }
  0x28   :  { %s747_s18 = scalar_lea.hbm %s1043_s5, 16 }
  0x29   :  { %p748_p2 = scmp.ne.s32.totalorder %s1043_s5, %s747_s18  ;;  %p751_p3 = scmp.lt.u32.totalorder %s747_s18, %s1043_s5 }
  0x2b   :  { %p753_p4 = pnand %p751_p3, %p748_p2 }
  0x2d   :  { %756 = shalt.err (!%p753_p4)
}
  0x2e   :  { %s757_s22 = scalar_lea.vmem %s56_s27, 16  ;;  %s761_s23 = scalar_lea.vmem %s56_s27, 32 }
  0x2f   :  { %p758_p5 = scmp.ne.s32.totalorder %s56_s27, %s757_s22  ;;  %p762_p6 = scmp.lt.s32.totalorder %s56_s27, %s56_s27 }
  0x30   :  { %p763_p7 = scmp.lt.s32.totalorder %s761_s23, %s757_s22 }
  0x32   :  { %p764_p8 = por %p763_p7, %p762_p6 }
  0x34   :  { %p765_p9 = pnand %p764_p8, %p758_p5 }
  0x36   :  { %768 = shalt.err (!%p765_p9)
}
  0x37   :  { %58 = dma.hbm_to_vmem [thread:$0]  %s1043_s5, 16, %s56_s27, [#allocation7]  }
  0x38   :  { %813 = dma.done.wait [#allocation4], 64  }
  0x39   :  { %814 = vsyncadd [#allocation4], 4294967232 }
  0x3a   :  { %815 = dma.done.wait [#allocation7], 528  }
  0x3b   :  { %816 = vsyncadd [#allocation7], 4294966768  ;;  %v826_v1 = vmov 0   ;;  %vm114_vm0 = vcmask 1042432   ;;  %vm101_vm1 = vcmask 23552   ;;  %v73_v3 = vld [vmem:[%s1039_s1] sm:$0xff] }
  0x3c   :  { %701 = vset.pattern.permute.xlu0 %v826_v1  ;;  %702 = vset.pattern.permute.xlu1 %v826_v1  ;;  %v72_v2 = vld [vmem:[#allocation3] sm:$0x7]  ;;  %v74_v4 = vld [vmem:[%s1039_s1 + $0x8] sm:$0xff]  ;;  %v75_v5 = vld [vmem:[%s1039_s1 + $0x10] sm:$0xff]  ;;  %vm235_vm2 = vcmask 261120   ;;  %v827_v38 = vmov 0.0|0.0  }
  0x3d   :  { %584 = vmatprep.subr.msk.mxu0 %vm114_vm0, %v72_v2  ;;  %586 = vmatprep.mubr.msk.f32.mxu0 %vm101_vm1, %v73_v3  ;;  %v77_v6 = vld [vmem:[%s1040_s2] sm:$0xff]  ;;  %v79_v7 = vld [vmem:[%s1040_s2 + $0x10] sm:$0xff]  ;;  %v78_v8 = vld [vmem:[%s1040_s2 + $0x8] sm:$0xff]  ;;  %vm828_vm3 = vmmov 0   ;;  %v829_v39 = vmov 0.0   ;;  %s830_s25 = smov [#allocation9]  }
  0x3e   :  { %585 = vmatpush3.msk.msra.mxu0 %vm114_vm0, %v72_v2  ;;  %83 = vperm.xlu0 %701, %v77_v6   ;;  %v76_v9 = vld [vmem:[%s1039_s1 + $0x18] sm:$0xff]  ;;  %v211_v11 = vld [vmem:[%s1042_s4] sm:$0xff]  ;;  %v212_v12 = vld [vmem:[%s1042_s4 + $0x8] sm:$0xff]  ;;  %s515_s26 = sshll.u32 %s830_s25, 4  ;;  %s516_s26 = int_to_ptr.vmem [resolvable:$true] %s515_s26 }
  0x3f   :  { %587 = vmatmul.mubr.msk.f32.vlgmr.msra.gmra.mrb[0].mxu0 %vm101_vm1, %v74_v4  ;;  %93 = vperm.xlu1 %702, %v79_v7   ;;  %v80_v10 = vld [vmem:[%s1040_s2 + $0x18] sm:$0xff]  ;;  %v213_v13 = vld [vmem:[%s1042_s4 + $0x10] sm:$0xff]  ;;  %v338_v15 = vld [vmem:[#allocation2] sm:$0x1]  ;;  %s769_s28 = scalar_lea.vmem %s516_s26, 16  ;;  %s773_s29 = scalar_lea.vmem %s516_s26, 32 }
  0x40   :  { %589 = vmatprep.mubr.msk.f32.mxu0 %vm101_vm1, %v75_v5  ;;  %v214_v14 = vld [vmem:[%s1042_s4 + $0x18] sm:$0xff]  ;;  %v207_v16 = vld [vmem:[#allocation6] sm:$0xff]  ;;  %v208_v35 = vld [vmem:[#allocation6 + $0x8] sm:$0xff]  ;;  %666 = vmatprep.subr.bf16.mxu1 %v827_v38  ;;  %p770_p10 = scmp.ne.s32.totalorder %s516_s26, %s769_s28  ;;  %p774_p11 = scmp.lt.s32.totalorder %s516_s26, %s516_s26 }
  0x41   :  { %v209_v36 = vld [vmem:[#allocation6 + $0x10] sm:$0xff]  ;;  %v210_v37 = vld [vmem:[#allocation6 + $0x18] sm:$0xff]  ;;  %649 = vmatprep.mubr.msk.f32.mxu1 %vm828_vm3, %v829_v39  ;;  %v422_v41 = vld [vmem:[%s1045_s7 + $0x8] sm:$0xff]  ;;  %p775_p12 = scmp.lt.s32.totalorder %s773_s29, %s769_s28 }
  0x42   :  { %88 = vperm.xlu0 %701, %v78_v8   ;;  %v421_v40 = vld [vmem:[%s1045_s7] sm:$0xff]  ;;  %v423_v42 = vld [vmem:[%s1045_s7 + $0x10] sm:$0xff]  ;;  %v424_v44 = vld [vmem:[%s1045_s7 + $0x18] sm:$0xff] }
  0x43   :  { %590 = vmatmul.mubr.msk.f32.gmra.mrb[2].mxu0 %vm101_vm1, %v76_v9  ;;  %98 = vperm.xlu1 %702, %v80_v10   ;;  %v667_v43 = vpack.c.bf16 %v422_v41, %v421_v40  ;;  %v670_v45 = vpack.c.bf16 %v424_v44, %v423_v42  ;;  %v425_v46 = vld [vmem:[%s1045_s7 + $0x20] sm:$0xff]  ;;  %v426_v47 = vld [vmem:[%s1045_s7 + $0x28] sm:$0xff]  ;;  %v427_v49 = vld [vmem:[%s1045_s7 + $0x30] sm:$0xff]  ;;  %p776_p13 = por %p775_p12, %p774_p11 }
  0x44   :  { %600 = vmatprep.mubr.msk.f32.mxu0 %vm235_vm2, %v207_v16  ;;  %v673_v48 = vpack.c.bf16 %v426_v47, %v425_v46  ;;  %v428_v50 = vld [vmem:[%s1045_s7 + $0x38] sm:$0xff]  ;;  %v429_v52 = vld [vmem:[%s1045_s7 + $0x40] sm:$0xff]  ;;  %v430_v53 = vld [vmem:[%s1045_s7 + $0x48] sm:$0xff] }
  0x45   :  { %668 = vmatpush3.bf16.msra.mxu1 %v667_v43  ;;  %v676_v51 = vpack.c.bf16 %v428_v50, %v427_v49  ;;  %v679_v54 = vpack.c.bf16 %v430_v53, %v429_v52  ;;  %v431_v55 = vld [vmem:[%s1045_s7 + $0x50] sm:$0xff]  ;;  %v432_v56 = vld [vmem:[%s1045_s7 + $0x58] sm:$0xff]  ;;  %v433_v58 = vld [vmem:[%s1045_s7 + $0x60] sm:$0xff]  ;;  %p777_p0 = pnand %p776_p13, %p770_p10 }
  0x46   :  { %217 = vperm.xlu0 %701, %v211_v11   ;;  %669 = vmatprep.subr.bf16.mxu1 %v827_v38  ;;  %v682_v57 = vpack.c.bf16 %v432_v56, %v431_v55  ;;  %v434_v59 = vld [vmem:[%s1045_s7 + $0x68] sm:$0xff]  ;;  %v435_v16 = vld [vmem:[%s1045_s7 + $0x70] sm:$0xff] }
  0x47   :  { %222 = vperm.xlu1 %702, %v212_v12   ;;  %v685_v60 = vpack.c.bf16 %v434_v59, %v433_v58 }
  0x49   :  { %671 = vmatpush3.bf16.msra.mxu1 %v670_v45 }
  0x4a   :  { %227 = vperm.xlu0 %701, %v213_v13   ;;  %672 = vmatprep.subr.bf16.mxu1 %v827_v38 }
  0x4b   :  { %232 = vperm.xlu1 %702, %v214_v14  }
  0x4d   :  { %674 = vmatpush3.bf16.msra.mxu1 %v673_v48 }
  0x4e   :  { %341 = vperm.xlu0 %701, %v338_v15   ;;  %675 = vmatprep.subr.bf16.mxu1 %v827_v38  ;;  %v337_v15 = vld [vmem:[#allocation8] sm:$0x1] }
  0x51   :  { %677 = vmatpush3.bf16.msra.mxu1 %v676_v51 }
  0x52   :  { %678 = vmatprep.subr.bf16.mxu1 %v827_v38 }
  0x55   :  { %680 = vmatpush3.bf16.msra.mxu1 %v679_v54 }
  0x56   :  { %681 = vmatprep.subr.bf16.mxu1 %v827_v38 }
  0x59   :  { %683 = vmatpush3.bf16.msra.mxu1 %v682_v57 }
  0x5a   :  { %684 = vmatprep.subr.bf16.mxu1 %v827_v38 }
  0x5d   :  { %686 = vmatpush3.bf16.msra.mxu1 %v685_v60 }
  0x5e   :  { %687 = vmatprep.subr.bf16.mxu1 %v827_v38 }
  0xbd   :  { %v84_v17 = vpop.permute.xlu0 %83 }
  0xbe   :  { %v94_v18 = vpop.permute.xlu1 %93 }
  0xc1   :  { %v89_v19 = vpop.permute.xlu0 %88 }
  0xc2   :  { %v99_v25 = vpop.permute.xlu1 %98 }
  0xc5   :  { %v218_v62 = vpop.permute.xlu0 %217 }
  0xc6   :  { %v223_v61 = vpop.permute.xlu1 %222 }
  0xc9   :  { %v228_v7 = vpop.permute.xlu0 %227 }
  0xca   :  { %v233_v4 = vpop.permute.xlu1 %232 }
 0x112   :  { %v588_v20 = vpop.f32.mrb[0].mxu0 }
 0x113   :  { %v190_v21 = vadd.f32 %v588_v20, %v89_v19  ;;  %v184_v22 = vpop.f32.mrb[1].mxu0  ;;  %v344_v19 = vlaneseq }
 0x114   :  { %v185_v23 = vadd.f32 %v184_v22, %v84_v17  ;;  %v436_v17 = vld [vmem:[%s1045_s7 + $0x78] sm:$0xff]  ;;  %v342_v22 = vpop.permute.xlu0 %341 }
 0x115   :  { %v204_v24 = vmax.f32 %v190_v21, 0.0  ;;  %v345_v20 = vshrl.u32 %v344_v19, 7 }
 0x116   :  { %v203_v26 = vmax.f32 %v185_v23, 0.0  ;;  %v591_v27 = vpop.f32.mrb[2].mxu0 }
 0x117   :  { %v200_v28 = vadd.f32 %v591_v27, %v99_v25  ;;  %v194_v29 = vpop.f32.mrb[3].mxu0  ;;  %v346_v21 = vsub.s32 0, %v345_v20 }
 0x118   :  { %v652_v30 = vpack.c.bf16 %v204_v24, %v203_v26  ;;  %v195_v31 = vadd.f32 %v194_v29, %v94_v18  ;;  %v688_v18 = vpack.c.bf16 %v436_v17, %v435_v16 }
 0x119   :  { %v206_v32 = vmax.f32 %v200_v28, 0.0  ;;  %v347_v23 = vrot.slane %v342_v22, %v346_v21 }
 0x11a   :  { %v205_v33 = vmax.f32 %v195_v31, 0.0  ;;  %653 = vmatprep.subr.bf16.mxu0 %v652_v30  ;;  %689 = vmatpush3.bf16.msra.mxu1 %v688_v18 }
 0x11b   :  { %655 = vmatpush3.bf16.msra.mxu0 %v652_v30 }
 0x11c   :  { %v656_v34 = vpack.c.bf16 %v206_v32, %v205_v33 }
 0x11e   :  { %657 = vmatprep.subr.bf16.mxu0 %v656_v34 }
 0x11f   :  { %659 = vmatpush3.bf16.msra.mxu0 %v656_v34 }
 0x120   :  { %660 = vmatprep.subr.bf16.mxu0 %v827_v38 }
 0x122   :  { %601 = vmatmul.mubr.msk.f32.vlgmr.msra.gmra.mrb[4].mxu0 %vm235_vm2, %v208_v35 }
 0x123   :  { %603 = vmatprep.mubr.msk.f32.mxu0 %vm235_vm2, %v209_v36 }
 0x126   :  { %604 = vmatmul.mubr.msk.f32.gmra.mrb[6].mxu0 %vm235_vm2, %v210_v37 }
 0x127   :  { %614 = vmatprep.mubr.msk.f32.mxu0 %vm828_vm3, %v829_v39 }
 0x1f5   :  { %v602_v63 = vpop.f32.mrb[4].mxu0 }
 0x1f6   :  { %v320_v0 = vadd.f32 %v602_v63, %v223_v61  ;;  %v314_v1 = vpop.f32.mrb[5].mxu0 }
 0x1f7   :  { %v315_v2 = vadd.f32 %v314_v1, %v218_v62 }
 0x1f8   :  { %v334_v3 = vmax.f32 %v320_v0, 0.0 }
 0x1f9   :  { %v333_v5 = vmax.f32 %v315_v2, 0.0  ;;  %v605_v6 = vpop.f32.mrb[6].mxu0 }
 0x1fa   :  { %v330_v8 = vadd.f32 %v605_v6, %v233_v4  ;;  %v324_v9 = vpop.f32.mrb[7].mxu0 }
 0x1fb   :  { %v661_v10 = vpack.c.bf16 %v334_v3, %v333_v5  ;;  %v325_v11 = vadd.f32 %v324_v9, %v228_v7 }
 0x1fc   :  { %v336_v12 = vmax.f32 %v330_v8, 0.0 }
 0x1fd   :  { %v335_v13 = vmax.f32 %v325_v11, 0.0  ;;  %662 = vmatpush3.bf16.msra.mxu0 %v661_v10 }
 0x1fe   :  { %663 = vmatprep.subr.bf16.mxu0 %v827_v38 }
 0x1ff   :  { %v664_v14 = vpack.c.bf16 %v336_v12, %v335_v13 }
 0x201   :  { %665 = vmatpush3.bf16.msra.mxu0 %v664_v14 }
 0x204   :  { %615 = vmatmul.mubr.msk.f32.vlgmr.msra.gmra.mrb[8].mxu0 %vm235_vm2, %v337_v15 }
 0x2d7   :  { %v417_v24 = vpop.f32.mrb[8].mxu0 }
 0x2d8   :  { %v418_v25 = vadd.f32 %v417_v24, %v347_v23  ;;  %v616_v26 = vpop.f32.mrb[9].mxu0 }
 0x2da   :  { %508 = vst [vmem:[#allocation9] sm:$0x1] %v418_v25  ;;  %650 = vmatmul.mubr.f32.vlgmr.msra.gmra.mrb[0].mxu1 %v418_v25 }
 0x2db   :  { %780 = shalt.err (!%p777_p0)
}
 0x2dc   :  { %s781_s27 = scalar_lea.hbm %s1046_s8, 16 }
 0x2dd   :  { %p782_p1 = scmp.ne.s32.totalorder %s1046_s8, %s781_s27  ;;  %p785_p2 = scmp.lt.u32.totalorder %s781_s27, %s1046_s8 }
 0x2df   :  { %p787_p3 = pnand %p785_p2, %p782_p1 }
 0x2e1   :  { %790 = shalt.err (!%p787_p3)
}
 0x2e2   :  { %518 = dma.vmem_to_hbm [thread:$0]  %s516_s26, 16, %s1046_s8, [#allocation5]  }
 0x2e3   :  { %s831_s12 = smov [#allocation10]  }
 0x2e4   :  { %s525_s15 = sshll.u32 %s831_s12, 4  ;;  %s526_s15 = int_to_ptr.vmem [resolvable:$true] %s525_s15 }
 0x2e5   :  { %s791_s16 = scalar_lea.vmem %s526_s15, 16  ;;  %s795_s17 = scalar_lea.vmem %s526_s15, 32 }
 0x2e6   :  { %p792_p4 = scmp.ne.s32.totalorder %s526_s15, %s791_s16  ;;  %p796_p5 = scmp.lt.s32.totalorder %s526_s15, %s526_s15 }
 0x2e7   :  { %p797_p6 = scmp.lt.s32.totalorder %s795_s17, %s791_s16 }
 0x2e9   :  { %p798_p7 = por %p797_p6, %p796_p5 }
 0x2eb   :  { %p799_p8 = pnand %p798_p7, %p792_p4 }
 0x3ad   :  { %v503_v27 = vpop.f32.mrb[0].mxu1 }
 0x3ae   :  { %507 = vst [vmem:[#allocation10] sm:$0x1] %v503_v27  ;;  %v651_v28 = vpop.f32.mrb[1].mxu1 }
 0x3af   :  { %802 = shalt.err (!%p799_p8)
}
 0x3b0   :  { %s803_s6 = scalar_lea.hbm %s1047_s9, 16 }
 0x3b1   :  { %p804_p9 = scmp.ne.s32.totalorder %s1047_s9, %s803_s6  ;;  %p807_p10 = scmp.lt.u32.totalorder %s803_s6, %s1047_s9 }
 0x3b3   :  { %p809_p11 = pnand %p807_p10, %p804_p9 }
 0x3b5   :  { %812 = shalt.err (!%p809_p11)
}
 0x3b6   :  { %528 = dma.vmem_to_hbm [thread:$0]  %s526_s15, 16, %s1047_s9, [#allocation11]  }
 0x3b7   :  { %817 = dma.done.wait [#allocation5], 16  }
 0x3b8   :  { %818 = vsyncadd [#allocation5], 4294967280 }
 0x3b9   :  { %819 = dma.done.wait [#allocation11], 16  }
 0x3ba   :  { %820 = vsyncadd [#allocation11], 4294967280 }
 0x3bb   :  { %535 = vsyncpa [#allocation4], 1 }
 0x3bc   :  { %536 = vsyncpa [#allocation7], 1 }
 0x3bd   :  { %537 = vsyncpa [#allocation5], 1 }
 0x3be   :  { %538 = vsyncpa [#allocation11], 1 }

</bundles_post_ra>
